<compile_context>
chip_gen: v6e
topology: v6e:2x2x1
jax: 0.10.0
libtpu: 0.0.40
codegen_flags: <defaults>
</compile_context>

<pallas_src>
import jax
import jax.numpy as jnp
from jax.experimental import pallas as pl
from jax.experimental.pallas import tpu as pltpu

LANE = 128
SUBLANE = 8


def _round_up(x, m):
    return (x + m - 1) // m * m


def decoder_step_kernel(x_ref, h_ref, c_ref,
                        wih_ref, whh_ref, bg_ref,
                        wlin_ref, blin_ref,
                        logits_ref, h1_ref, c1_ref,
                        h1b_ref):
    """LSTM cell (computed once) + vocab-tiled output projection.

    Grid axis 0 tiles the (padded) vocab.  The LSTM state outputs use a
    constant block index, so they stay resident in VMEM across all vocab
    tiles; the cell math runs only at j == 0.
    """
    j = pl.program_id(0)
    Hp = h_ref.shape[-1]

    @pl.when(j == 0)
    def _():
        x = x_ref[...]                               # (Bp, Kp) bf16
        h = h_ref[...].astype(jnp.bfloat16)          # (Bp, Hp) bf16 for MXU
        # Fused gate matmuls, f32 accumulation: (Bp,Kp)@(Kp,4Hp) + (Bp,Hp)@(Hp,4Hp)
        gates = (jnp.dot(x, wih_ref[...], preferred_element_type=jnp.float32)
                 + jnp.dot(h, whh_ref[...], preferred_element_type=jnp.float32)
                 + bg_ref[...])
        # Gate-blocked layout: each gate is a 128-aligned, Hp-wide lane block.
        i_g = jax.nn.sigmoid(gates[:, 0 * Hp:1 * Hp])
        f_g = jax.nn.sigmoid(gates[:, 1 * Hp:2 * Hp])
        g_g = jnp.tanh(gates[:, 2 * Hp:3 * Hp])
        o_g = jax.nn.sigmoid(gates[:, 3 * Hp:4 * Hp])

        c1 = f_g * c_ref[...] + i_g * g_g
        h1 = o_g * jnp.tanh(c1)

        c1_ref[...] = c1
        h1_ref[...] = h1
        h1b_ref[...] = h1.astype(jnp.bfloat16)       # bf16 copy for MXU reuse

    # Output projection tile j: (Bp,Hp)@(Hp,TN) + bias, lane-dense store.
    logits_ref[...] = (jnp.dot(h1b_ref[...], wlin_ref[...],
                               preferred_element_type=jnp.float32)
                       + blin_ref[...])


def pack_params(params):
    """One-time weight prep: gate-blocking, lane padding, bf16 cast, transposes.

    Done once (outside the per-step hot path) so a decode loop reuses the
    packed tensors every step.
    """
    V, E = params["emb_weight"].shape
    H = params["w_hh"].shape[1]
    K = 2 * E

    Hp = _round_up(H, LANE)
    Kp = _round_up(K, LANE)
    Vp = _round_up(V, LANE)

    # PyTorch LSTM weights (4H, in) -> gate-blocked, zero-padded, transposed:
    # column block g of width Hp holds gate g (order i,f,g,o).
    w_ih_g = params["w_ih"].reshape(4, H, K)
    w_ih_g = jnp.pad(w_ih_g, ((0, 0), (0, Hp - H), (0, Kp - K)))
    wih_t = jnp.transpose(w_ih_g, (2, 0, 1)).reshape(Kp, 4 * Hp).astype(jnp.bfloat16)

    w_hh_g = params["w_hh"].reshape(4, H, H)
    w_hh_g = jnp.pad(w_hh_g, ((0, 0), (0, Hp - H), (0, Hp - H)))
    whh_t = jnp.transpose(w_hh_g, (2, 0, 1)).reshape(Hp, 4 * Hp).astype(jnp.bfloat16)

    b_g = (params["b_ih"] + params["b_hh"]).reshape(4, H)
    b_g = jnp.pad(b_g, ((0, 0), (0, Hp - H))).reshape(1, 4 * Hp).astype(jnp.float32)

    wlin_t = jnp.pad(params["w_lin"].T,
                     ((0, Hp - H), (0, Vp - V))).astype(jnp.bfloat16)   # (Hp, Vp)
    blin = jnp.pad(params["b_lin"], (0, Vp - V)).reshape(1, Vp).astype(jnp.float32)

    return {
        "emb_weight": params["emb_weight"].astype(jnp.float32),  # (V, E) for gather
        "wih_t": wih_t,
        "whh_t": whh_t,
        "bg": b_g,
        "wlin_t": wlin_t,
        "blin": blin,
    }


@jax.jit
def decoder_forward(features, hashtags, h, c, packed):
    """JAX wrapper reproducing DecoderRNN_IMGFeat.forward (single LSTM step)."""
    B, E = features.shape
    H = h.shape[-1]
    V = packed["emb_weight"].shape[0]

    Kp = packed["wih_t"].shape[0]
    Hp = packed["whh_t"].shape[0]
    Vp = packed["wlin_t"].shape[1]
    Bp = _round_up(B, SUBLANE)

    # Largest lane-dense vocab tile that divides Vp (Vp is a multiple of 128).
    TN = next(t for t in (512, 256, 128) if Vp % t == 0)
    n_vt = Vp // TN

    # ---- glue: embedding gather, concat, activation padding ----
    emb = packed["emb_weight"][hashtags]                       # (B, E)
    x = jnp.concatenate([features, emb], axis=-1)              # (B, 2E)

    def pad2(a, r, cdim):
        return jnp.pad(a, ((0, r - a.shape[0]), (0, cdim - a.shape[1])))

    x_p = pad2(x, Bp, Kp).astype(jnp.bfloat16)                 # (Bp, Kp)
    h_p = pad2(h[0], Bp, Hp).astype(jnp.float32)               # (Bp, Hp)
    c_p = pad2(c[0], Bp, Hp).astype(jnp.float32)               # (Bp, Hp)

    fixed = lambda shape: pl.BlockSpec(shape, lambda j: (0, 0))

    cost = pl.CostEstimate(
        flops=2 * Bp * (Kp * 4 * Hp + Hp * 4 * Hp + Hp * Vp),
        transcendentals=Bp * 5 * Hp,
        bytes_accessed=(2 * (Kp * 4 * Hp + Hp * 4 * Hp + Hp * Vp)      # bf16 weights
                        + 4 * (Bp * (Kp + 2 * Hp) + 4 * Hp + Vp)        # inputs/bias
                        + 4 * (Bp * Vp + 2 * Bp * Hp)))                 # outputs

    logits_p, h1_p, c1_p = pl.pallas_call(
        decoder_step_kernel,
        out_shape=(
            jax.ShapeDtypeStruct((Bp, Vp), jnp.float32),
            jax.ShapeDtypeStruct((Bp, Hp), jnp.float32),
            jax.ShapeDtypeStruct((Bp, Hp), jnp.float32),
        ),
        grid=(n_vt,),
        in_specs=[
            fixed((Bp, Kp)),                          # x
            fixed((Bp, Hp)),                          # h
            fixed((Bp, Hp)),                          # c
            fixed((Kp, 4 * Hp)),                      # W_ih^T (gate-blocked)
            fixed((Hp, 4 * Hp)),                      # W_hh^T (gate-blocked)
            fixed((1, 4 * Hp)),                       # b_ih + b_hh (gate-blocked)
            pl.BlockSpec((Hp, TN), lambda j: (0, j)),  # W_lin^T vocab tile
            pl.BlockSpec((1, TN), lambda j: (0, j)),   # b_lin vocab tile
        ],
        out_specs=(
            pl.BlockSpec((Bp, TN), lambda j: (0, j)),  # logits vocab tile
            fixed((Bp, Hp)),                           # h1 (resident across tiles)
            fixed((Bp, Hp)),                           # c1 (resident across tiles)
        ),
        scratch_shapes=[pltpu.VMEM((Bp, Hp), jnp.bfloat16)],   # bf16 h1 for MXU reuse
        input_output_aliases={1: 1, 2: 2},             # h,c updated in place
        cost_estimate=cost,
        compiler_params=pltpu.CompilerParams(
            # h1/c1 are resident across the vocab axis -> must stay sequential.
            dimension_semantics=("arbitrary",)),
    )(x_p, h_p, c_p, packed["wih_t"], packed["whh_t"], packed["bg"],
      packed["wlin_t"], packed["blin"])

    logits = logits_p[:B, :V]
    h1 = h1_p[:B, :H]
    c1 = c1_p[:B, :H]
    # restore PyTorch (num_layers, B, H) convention for the LSTM state
    return logits, (h1[None], c1[None])


def reference_forward(features, hashtags, h, c, params):
    """Pure-JAX f32 reference (mirrors torch.nn.LSTM single-step math)."""
    emb = params["emb_weight"][hashtags]
    x = jnp.concatenate([features, emb], axis=-1)
    gates = (x @ params["w_ih"].T + params["b_ih"]
             + h[0] @ params["w_hh"].T + params["b_hh"])
    H = params["w_hh"].shape[1]
    i = jax.nn.sigmoid(gates[:, 0:H])
    f = jax.nn.sigmoid(gates[:, H:2 * H])
    g = jnp.tanh(gates[:, 2 * H:3 * H])
    o = jax.nn.sigmoid(gates[:, 3 * H:4 * H])
    c1 = f * c[0] + i * g
    h1 = o * jnp.tanh(c1)
    logits = h1 @ params["w_lin"].T + params["b_lin"]
    return logits, (h1[None], c1[None])


if __name__ == "__main__":
    # Small, forward-consistent shapes.
    B = 8            # batch
    E = 16           # embed_size   (LSTM input is 2*E)
    H = 32           # hidden_size
    V = 64           # output_size (vocab)

    key = jax.random.PRNGKey(0)
    ks = jax.random.split(key, 12)

    params = {
        "emb_weight": jax.random.normal(ks[0], (V, E), jnp.float32) * 0.1,
        "w_ih":       jax.random.normal(ks[1], (4 * H, 2 * E), jnp.float32) * 0.1,
        "w_hh":       jax.random.normal(ks[2], (4 * H, H), jnp.float32) * 0.1,
        "b_ih":       jax.random.normal(ks[3], (4 * H,), jnp.float32) * 0.1,
        "b_hh":       jax.random.normal(ks[4], (4 * H,), jnp.float32) * 0.1,
        "w_lin":      jax.random.normal(ks[5], (V, H), jnp.float32) * 0.1,
        "b_lin":      jax.random.normal(ks[6], (V,), jnp.float32) * 0.1,
    }

    features = jax.random.normal(ks[7], (B, E), jnp.float32)
    hashtags = jax.random.randint(ks[8], (B,), 0, V, jnp.int32)
    h0 = jax.random.normal(ks[9], (1, B, H), jnp.float32)
    c0 = jax.random.normal(ks[10], (1, B, H), jnp.float32)

    packed = pack_params(params)        # one-time weight prep (outside hot path)

    logits, (h1, c1) = decoder_forward(features, hashtags, h0, c0, packed)
    jax.block_until_ready((logits, h1, c1))

    ref_logits, (ref_h1, ref_c1) = reference_forward(
        features, hashtags, h0, c0, params)

    assert logits.shape == (B, V) and h1.shape == (1, B, H) and c1.shape == (1, B, H)
    # bf16 weights/activations on the MXU (f32 accumulate) -> loosened tolerance.
    assert jnp.allclose(logits, ref_logits, atol=2e-2)
    assert jnp.allclose(h1, ref_h1, atol=2e-2)
    assert jnp.allclose(c1, ref_c1, atol=2e-2)

    print("KERNEL_OK")
</pallas_src>

<mosaic_0001>
module attributes {stable_mosaic.version = 11 : i64} {
  func.func @decoder_step_kernel(%arg0: i32, %arg1: memref<8x128xbf16, #tpu.memory_space<vmem>>, %arg2: memref<8x128xf32, #tpu.memory_space<vmem>>, %arg3: memref<8x128xf32, #tpu.memory_space<vmem>>, %arg4: memref<128x512xbf16, #tpu.memory_space<vmem>>, %arg5: memref<128x512xbf16, #tpu.memory_space<vmem>>, %arg6: memref<1x512xf32, #tpu.memory_space<vmem>>, %arg7: memref<128x128xbf16, #tpu.memory_space<vmem>>, %arg8: memref<1x128xf32, #tpu.memory_space<vmem>>, %arg9: memref<8x128xf32, #tpu.memory_space<vmem>>, %arg10: memref<8x128xf32, #tpu.memory_space<vmem>>, %arg11: memref<8x128xf32, #tpu.memory_space<vmem>>, %arg12: memref<8x128xbf16, #tpu.memory_space<vmem>>) attributes {dimension_semantics = [#tpu.dimension_semantics<arbitrary>], iteration_bounds = array<i64: 1>, scalar_prefetch = 0 : i64, scratch_operands = 1 : i64, tpu.core_type = #tpu.core_type<tc>, window_params = [{pipeline_mode = #tpu.pipeline_mode<synchronous>, transform_indices = @transform_0, window_bounds = array<i64: 8, 128>}, {pipeline_mode = #tpu.pipeline_mode<synchronous>, transform_indices = @transform_1, window_bounds = array<i64: 8, 128>}, {pipeline_mode = #tpu.pipeline_mode<synchronous>, transform_indices = @transform_2, window_bounds = array<i64: 8, 128>}, {pipeline_mode = #tpu.pipeline_mode<synchronous>, transform_indices = @transform_3, window_bounds = array<i64: 128, 512>}, {pipeline_mode = #tpu.pipeline_mode<synchronous>, transform_indices = @transform_4, window_bounds = array<i64: 128, 512>}, {pipeline_mode = #tpu.pipeline_mode<synchronous>, transform_indices = @transform_5, window_bounds = array<i64: 1, 512>}, {transform_indices = @transform_6, window_bounds = array<i64: 128, 128>}, {transform_indices = @transform_7, window_bounds = array<i64: 1, 128>}, {transform_indices = @transform_8, window_bounds = array<i64: 8, 128>}, {pipeline_mode = #tpu.pipeline_mode<synchronous>, transform_indices = @transform_9, window_bounds = array<i64: 8, 128>}, {pipeline_mode = #tpu.pipeline_mode<synchronous>, transform_indices = @transform_10, window_bounds = array<i64: 8, 128>}]} {
    %c0_i32 = arith.constant 0 : i32
    %0 = arith.cmpi eq, %arg0, %c0_i32 : i32
    %1 = arith.extui %0 : i1 to i32
    %c0_i32_0 = arith.constant 0 : i32
    %2 = arith.cmpi ne, %1, %c0_i32_0 : i32
    scf.if %2 {
      %c0_8 = arith.constant 0 : index
      %c0_9 = arith.constant 0 : index
      %10 = vector.load %arg1[%c0_8, %c0_9] : memref<8x128xbf16, #tpu.memory_space<vmem>>, vector<8x128xbf16>
      %c0_10 = arith.constant 0 : index
      %c0_11 = arith.constant 0 : index
      %11 = vector.load %arg2[%c0_10, %c0_11] : memref<8x128xf32, #tpu.memory_space<vmem>>, vector<8x128xf32>
      %12 = arith.truncf %11 : vector<8x128xf32> to vector<8x128xbf16>
      %c0_12 = arith.constant 0 : index
      %c0_13 = arith.constant 0 : index
      %13 = vector.load %arg4[%c0_12, %c0_13] : memref<128x512xbf16, #tpu.memory_space<vmem>>, vector<128x512xbf16>
      %cst_14 = arith.constant dense<0.000000e+00> : vector<8x512xf32>
      %14 = tpu.matmul %10, %13, %cst_14 {dimension_numbers = #tpu.dot_dimension_numbers<[1], [0], [0], [1], [0, 0, 1, 1], [], []>} : vector<8x128xbf16>, vector<128x512xbf16>, vector<8x512xf32> -> vector<8x512xf32>
      %c0_15 = arith.constant 0 : index
      %c0_16 = arith.constant 0 : index
      %15 = vector.load %arg5[%c0_15, %c0_16] : memref<128x512xbf16, #tpu.memory_space<vmem>>, vector<128x512xbf16>
      %cst_17 = arith.constant dense<0.000000e+00> : vector<8x512xf32>
      %16 = tpu.matmul %12, %15, %cst_17 {dimension_numbers = #tpu.dot_dimension_numbers<[1], [0], [0], [1], [0, 0, 1, 1], [], []>} : vector<8x128xbf16>, vector<128x512xbf16>, vector<8x512xf32> -> vector<8x512xf32>
      %17 = arith.addf %14, %16 : vector<8x512xf32>
      %c0_18 = arith.constant 0 : index
      %c0_19 = arith.constant 0 : index
      %18 = vector.load %arg6[%c0_18, %c0_19] : memref<1x512xf32, #tpu.memory_space<vmem>>, vector<1x512xf32>
      %19 = vector.broadcast %18 : vector<1x512xf32> to vector<8x512xf32>
      %20 = arith.addf %17, %19 : vector<8x512xf32>
      %21 = vector.extract_strided_slice %20 {offsets = [0, 0], sizes = [8, 128], strides = [1, 1]} : vector<8x512xf32> to vector<8x128xf32>
      %22 = arith.negf %21 : vector<8x128xf32>
      %23 = math.exp %22 : vector<8x128xf32>
      %cst_20 = arith.constant 1.000000e+00 : f32
      %24 = vector.broadcast %cst_20 : f32 to vector<8x128xf32>
      %25 = arith.addf %24, %23 : vector<8x128xf32>
      %26 = arith.divf %24, %25 : vector<8x128xf32>
      %27 = vector.extract_strided_slice %20 {offsets = [0, 128], sizes = [8, 128], strides = [1, 1]} : vector<8x512xf32> to vector<8x128xf32>
      %28 = arith.negf %27 : vector<8x128xf32>
      %29 = math.exp %28 : vector<8x128xf32>
      %cst_21 = arith.constant 1.000000e+00 : f32
      %30 = vector.broadcast %cst_21 : f32 to vector<8x128xf32>
      %31 = arith.addf %30, %29 : vector<8x128xf32>
      %32 = arith.divf %30, %31 : vector<8x128xf32>
      %33 = vector.extract_strided_slice %20 {offsets = [0, 256], sizes = [8, 128], strides = [1, 1]} : vector<8x512xf32> to vector<8x128xf32>
      %34 = math.tanh %33 : vector<8x128xf32>
      %35 = vector.extract_strided_slice %20 {offsets = [0, 384], sizes = [8, 128], strides = [1, 1]} : vector<8x512xf32> to vector<8x128xf32>
      %36 = arith.negf %35 : vector<8x128xf32>
      %37 = math.exp %36 : vector<8x128xf32>
      %cst_22 = arith.constant 1.000000e+00 : f32
      %38 = vector.broadcast %cst_22 : f32 to vector<8x128xf32>
      %39 = arith.addf %38, %37 : vector<8x128xf32>
      %40 = arith.divf %38, %39 : vector<8x128xf32>
      %c0_23 = arith.constant 0 : index
      %c0_24 = arith.constant 0 : index
      %41 = vector.load %arg3[%c0_23, %c0_24] : memref<8x128xf32, #tpu.memory_space<vmem>>, vector<8x128xf32>
      %42 = arith.mulf %32, %41 : vector<8x128xf32>
      %43 = arith.mulf %26, %34 : vector<8x128xf32>
      %44 = arith.addf %42, %43 : vector<8x128xf32>
      %45 = math.tanh %44 : vector<8x128xf32>
      %46 = arith.mulf %40, %45 : vector<8x128xf32>
      %c0_25 = arith.constant 0 : index
      %c0_26 = arith.constant 0 : index
      %47 = vector.load %arg11[%c0_25, %c0_26] : memref<8x128xf32, #tpu.memory_space<vmem>>, vector<8x128xf32>
      tpu.vector_store %arg11[%c0_25, %c0_26], %44 {strides = array<i32>} : memref<8x128xf32, #tpu.memory_space<vmem>>, vector<8x128xf32>,
      %c0_27 = arith.constant 0 : index
      %c0_28 = arith.constant 0 : index
      %48 = vector.load %arg10[%c0_27, %c0_28] : memref<8x128xf32, #tpu.memory_space<vmem>>, vector<8x128xf32>
      tpu.vector_store %arg10[%c0_27, %c0_28], %46 {strides = array<i32>} : memref<8x128xf32, #tpu.memory_space<vmem>>, vector<8x128xf32>,
      %49 = arith.truncf %46 : vector<8x128xf32> to vector<8x128xbf16>
      %c0_29 = arith.constant 0 : index
      %c0_30 = arith.constant 0 : index
      %50 = vector.load %arg12[%c0_29, %c0_30] : memref<8x128xbf16, #tpu.memory_space<vmem>>, vector<8x128xbf16>
      tpu.vector_store %arg12[%c0_29, %c0_30], %49 {strides = array<i32>} : memref<8x128xbf16, #tpu.memory_space<vmem>>, vector<8x128xbf16>,
    } else {
    }
    %c0 = arith.constant 0 : index
    %c0_1 = arith.constant 0 : index
    %3 = vector.load %arg12[%c0, %c0_1] : memref<8x128xbf16, #tpu.memory_space<vmem>>, vector<8x128xbf16>
    %c0_2 = arith.constant 0 : index
    %c0_3 = arith.constant 0 : index
    %4 = vector.load %arg7[%c0_2, %c0_3] : memref<128x128xbf16, #tpu.memory_space<vmem>>, vector<128x128xbf16>
    %cst = arith.constant dense<0.000000e+00> : vector<8x128xf32>
    %5 = tpu.matmul %3, %4, %cst {dimension_numbers = #tpu.dot_dimension_numbers<[1], [0], [0], [1], [0, 0, 1, 1], [], []>} : vector<8x128xbf16>, vector<128x128xbf16>, vector<8x128xf32> -> vector<8x128xf32>
    %c0_4 = arith.constant 0 : index
    %c0_5 = arith.constant 0 : index
    %6 = vector.load %arg8[%c0_4, %c0_5] : memref<1x128xf32, #tpu.memory_space<vmem>>, vector<1x128xf32>
    %7 = vector.broadcast %6 : vector<1x128xf32> to vector<8x128xf32>
    %8 = arith.addf %5, %7 : vector<8x128xf32>
    %c0_6 = arith.constant 0 : index
    %c0_7 = arith.constant 0 : index
    %9 = vector.load %arg9[%c0_6, %c0_7] : memref<8x128xf32, #tpu.memory_space<vmem>>, vector<8x128xf32>
    tpu.vector_store %arg9[%c0_6, %c0_7], %8 {strides = array<i32>} : memref<8x128xf32, #tpu.memory_space<vmem>>, vector<8x128xf32>,
    return
  }
  func.func @transform_0(%arg0: i32) -> (i32, i32) {
    %c0_i32 = arith.constant 0 : i32
    %c0_i32_0 = arith.constant 0 : i32
    %c0_i32_1 = arith.constant 0 : i32
    return %c0_i32, %c0_i32_0 : i32, i32
  }
  func.func @transform_1(%arg0: i32) -> (i32, i32) {
    %c0_i32 = arith.constant 0 : i32
    %c0_i32_0 = arith.constant 0 : i32
    %c0_i32_1 = arith.constant 0 : i32
    return %c0_i32, %c0_i32_0 : i32, i32
  }
  func.func @transform_2(%arg0: i32) -> (i32, i32) {
    %c0_i32 = arith.constant 0 : i32
    %c0_i32_0 = arith.constant 0 : i32
    %c0_i32_1 = arith.constant 0 : i32
    return %c0_i32, %c0_i32_0 : i32, i32
  }
  func.func @transform_3(%arg0: i32) -> (i32, i32) {
    %c0_i32 = arith.constant 0 : i32
    %c0_i32_0 = arith.constant 0 : i32
    %c0_i32_1 = arith.constant 0 : i32
    return %c0_i32, %c0_i32_0 : i32, i32
  }
  func.func @transform_4(%arg0: i32) -> (i32, i32) {
    %c0_i32 = arith.constant 0 : i32
    %c0_i32_0 = arith.constant 0 : i32
    %c0_i32_1 = arith.constant 0 : i32
    return %c0_i32, %c0_i32_0 : i32, i32
  }
  func.func @transform_5(%arg0: i32) -> (i32, i32) {
    %c0_i32 = arith.constant 0 : i32
    %c0_i32_0 = arith.constant 0 : i32
    %c0_i32_1 = arith.constant 0 : i32
    return %c0_i32, %c0_i32_0 : i32, i32
  }
  func.func @transform_6(%arg0: i32) -> (i32, i32) {
    %c0_i32 = arith.constant 0 : i32
    %c0_i32_0 = arith.constant 0 : i32
    return %c0_i32, %arg0 : i32, i32
  }
  func.func @transform_7(%arg0: i32) -> (i32, i32) {
    %c0_i32 = arith.constant 0 : i32
    %c0_i32_0 = arith.constant 0 : i32
    return %c0_i32, %arg0 : i32, i32
  }
  func.func @transform_8(%arg0: i32) -> (i32, i32) {
    %c0_i32 = arith.constant 0 : i32
    %c0_i32_0 = arith.constant 0 : i32
    return %c0_i32, %arg0 : i32, i32
  }
  func.func @transform_9(%arg0: i32) -> (i32, i32) {
    %c0_i32 = arith.constant 0 : i32
    %c0_i32_0 = arith.constant 0 : i32
    %c0_i32_1 = arith.constant 0 : i32
    return %c0_i32, %c0_i32_0 : i32, i32
  }
  func.func @transform_10(%arg0: i32) -> (i32, i32) {
    %c0_i32 = arith.constant 0 : i32
    %c0_i32_0 = arith.constant 0 : i32
    %c0_i32_1 = arith.constant 0 : i32
    return %c0_i32, %c0_i32_0 : i32, i32
  }
}

</mosaic_0001>

<bundles_post_ra>
// kernel: decoder_forward.1
= control target key start
LH: loop header
LB: loop body
LE: loop exit
PB: predicated region body
PF: predicated region fallthrough
CT: control target
= control target key end

     0   :  { %16 = vsyncpa [#allocation4], 0  ;;  %s1229_s0 = inlined_call_operand.vmem [shape: bf16[8,128], index: 0, kind: input, shape index: {}]   ;;  %s1230_s1 = inlined_call_operand.vmem [shape: f32[8,128], index: 1, kind: input, shape index: {}, may-alias: {1,9}]   ;;  %s1231_s2 = inlined_call_operand.vmem [shape: f32[8,128], index: 2, kind: input, shape index: {}, may-alias: {2,10}]   ;;  %s1232_s3 = inlined_call_operand.hbm [shape: bf16[128,512], index: 3, kind: input, shape index: {}]   ;;  %s1233_s4 = inlined_call_operand.hbm [shape: bf16[128,512], index: 4, kind: input, shape index: {}]   ;;  %s1234_s5 = inlined_call_operand.vmem [shape: f32[1,512], index: 5, kind: input, shape index: {}]   ;;  %s1235_s6 = inlined_call_operand.vmem [shape: bf16[128,128], index: 6, kind: input, shape index: {}]   ;;  %s1236_s7 = inlined_call_operand.vmem [shape: f32[1,128], index: 7, kind: input, shape index: {}]   ;;  %s1237_s8 = inlined_call_operand.hbm [shape: f32[8,128], index: 8, kind: output, shape index: {0}]   ;;  %s1238_s9 = inlined_call_operand.vmem [shape: f32[8,128], index: 9, kind: output, shape index: {1}, may-alias: {1,9}]   ;;  %s1239_s10 = inlined_call_operand.vmem [shape: f32[8,128], index: 10, kind: output, shape index: {2}, may-alias: {2,10}]  }
   0x1   :  { %17 = vsyncpa [#allocation7], 0 }
   0x2   :  { %18 = vsyncpa [#allocation5], 0  ;;  %s1108_s13 = smov [#allocation3]  }
   0x3   :  { %s30_s14 = sshll.u32 %s1108_s13, 4  ;;  %s31_s14 = int_to_ptr.vmem [resolvable:$true] %s30_s14 }
   0x4   :  { %s1050_s15 = scalar_lea.vmem %s31_s14, 4096  ;;  %p1055_p1 = scmp.lt.s32.totalorder %s31_s14, %s31_s14 }
   0x5   :  { %p1051_p0 = scmp.ne.s32.totalorder %s31_s14, %s1050_s15  ;;  %p1056_p2 = scmp.lt.s32.totalorder %s1050_s15, %s1050_s15 }
   0x7   :  { %p1057_p3 = por %p1056_p2, %p1055_p1 }
   0x9   :  { %p1058_p4 = pnand %p1057_p3, %p1051_p0 }
   0xb   :  { %1061 = shalt.err (!%p1058_p4)
}
   0xc   :  { %s1109_s16 = smov 256   ;;  %s1110_s17 = smov 16  }
   0xd   :  { %36 = dma.hbm_to_vmem [thread:$0]  %s1232_s3, 4096, %s31_s14, [#allocation4], %s1109_s16, %s1109_s16, %s1110_s17  }
   0xe   :  { %s1111_s20 = smov [#allocation6]  }
   0xf   :  { %s42_s21 = sshll.u32 %s1111_s20, 4  ;;  %s43_s21 = int_to_ptr.vmem [resolvable:$true] %s42_s21 }
  0x10   :  { %s1070_s22 = scalar_lea.vmem %s43_s21, 4096  ;;  %p1075_p6 = scmp.lt.s32.totalorder %s43_s21, %s43_s21 }
  0x11   :  { %p1071_p5 = scmp.ne.s32.totalorder %s43_s21, %s1070_s22  ;;  %p1076_p7 = scmp.lt.s32.totalorder %s1070_s22, %s1070_s22 }
  0x13   :  { %p1077_p8 = por %p1076_p7, %p1075_p6 }
  0x15   :  { %p1078_p9 = pnand %p1077_p8, %p1071_p5 }
  0x17   :  { %1081 = shalt.err (!%p1078_p9)
}
  0x18   :  { %48 = dma.hbm_to_vmem [thread:$0]  %s1233_s4, 4096, %s43_s21, [#allocation7], %s1109_s16, %s1109_s16, %s1110_s17  }
  0x19   :  { %1102 = dma.done.wait [#allocation4], 4096  }
  0x1a   :  { %1103 = vsyncadd [#allocation4], 4294963200 }
  0x1b   :  { %1104 = dma.done.wait [#allocation7], 4096  }
  0x1c   :  { %1105 = vsyncadd [#allocation7], 4294963200  ;;  %v1112_v0 = vmov 0   ;;  %v922_v1 = vld [vmem:[#allocation6 + $0xe4] ss:$16 sps:$4 sm:$0xff]   ;;  %v67_v33 = vld [vmem:[%s1230_s1] sm:$0xff] }
  0x1d   :  { %325 = vmatprep.mubr.bf16.mxu0 %v1112_v0  ;;  %366 = vmatprep.mubr.bf16.mxu1 %v1112_v0  ;;  %v924_v2 = vld [vmem:[#allocation6 + $0xec] ss:$16 sps:$4 sm:$0xff]   ;;  %v926_v3 = vld [vmem:[#allocation6 + $0xe0] ss:$16 sps:$4 sm:$0xff]   ;;  %v927_v4 = vld [vmem:[#allocation6 + $0xe8] ss:$16 sps:$4 sm:$0xff]   ;;  %v68_v36 = vpack.c.bf16 %v67_v33, %v67_v33 }
  0x1e   :  { %293 = vmatprep.subr.bf16.mxu0 %v922_v1  ;;  %334 = vmatprep.subr.bf16.mxu1 %v924_v2  ;;  %v928_v5 = vld [vmem:[#allocation6 + $0xc4] ss:$16 sps:$4 sm:$0xff]   ;;  %v930_v6 = vld [vmem:[#allocation6 + $0xcc] ss:$16 sps:$4 sm:$0xff]   ;;  %v932_v7 = vld [vmem:[#allocation6 + $0xc0] ss:$16 sps:$4 sm:$0xff]  }
  0x1f   :  { %294 = vmatpush1.bf16.msra.mxu0 %v926_v3  ;;  %335 = vmatpush1.bf16.msra.mxu1 %v927_v4  ;;  %v933_v8 = vld [vmem:[#allocation6 + $0xc8] ss:$16 sps:$4 sm:$0xff]   ;;  %v934_v9 = vld [vmem:[#allocation6 + $0xa4] ss:$16 sps:$4 sm:$0xff]   ;;  %v936_v10 = vld [vmem:[#allocation6 + $0xac] ss:$16 sps:$4 sm:$0xff]  }
  0x20   :  { %295 = vmatprep.subr.bf16.mxu0 %v928_v5  ;;  %336 = vmatprep.subr.bf16.mxu1 %v930_v6  ;;  %v938_v11 = vld [vmem:[#allocation6 + $0xa0] ss:$16 sps:$4 sm:$0xff]   ;;  %v939_v12 = vld [vmem:[#allocation6 + $0xa8] ss:$16 sps:$4 sm:$0xff]   ;;  %v940_v13 = vld [vmem:[#allocation6 + $0x84] ss:$16 sps:$4 sm:$0xff]  }
  0x21   :  { %v942_v14 = vld [vmem:[#allocation6 + $0x8c] ss:$16 sps:$4 sm:$0xff]   ;;  %v944_v15 = vld [vmem:[#allocation6 + $0x80] ss:$16 sps:$4 sm:$0xff]   ;;  %v945_v16 = vld [vmem:[#allocation6 + $0x88] ss:$16 sps:$4 sm:$0xff]  }
  0x22   :  { %v946_v17 = vld [vmem:[#allocation6 + $0x64] ss:$16 sps:$4 sm:$0xff]   ;;  %v948_v18 = vld [vmem:[#allocation6 + $0x6c] ss:$16 sps:$4 sm:$0xff]   ;;  %v950_v19 = vld [vmem:[#allocation6 + $0x60] ss:$16 sps:$4 sm:$0xff]  }
  0x23   :  { %296 = vmatpush1.bf16.msra.mxu0 %v932_v7  ;;  %337 = vmatpush1.bf16.msra.mxu1 %v933_v8  ;;  %v951_v20 = vld [vmem:[#allocation6 + $0x68] ss:$16 sps:$4 sm:$0xff]   ;;  %v952_v21 = vld [vmem:[#allocation6 + $0x44] ss:$16 sps:$4 sm:$0xff]   ;;  %v954_v22 = vld [vmem:[#allocation6 + $0x4c] ss:$16 sps:$4 sm:$0xff]  }
  0x24   :  { %297 = vmatprep.subr.bf16.mxu0 %v934_v9  ;;  %338 = vmatprep.subr.bf16.mxu1 %v936_v10  ;;  %v956_v23 = vld [vmem:[#allocation6 + $0x40] ss:$16 sps:$4 sm:$0xff]   ;;  %v957_v24 = vld [vmem:[#allocation6 + $0x48] ss:$16 sps:$4 sm:$0xff]   ;;  %v958_v25 = vld [vmem:[#allocation6 + $0x24] ss:$16 sps:$4 sm:$0xff]  }
  0x25   :  { %v960_v26 = vld [vmem:[#allocation6 + $0x2c] ss:$16 sps:$4 sm:$0xff]   ;;  %v962_v27 = vld [vmem:[#allocation6 + $0x20] ss:$16 sps:$4 sm:$0xff]   ;;  %v963_v28 = vld [vmem:[#allocation6 + $0x28] ss:$16 sps:$4 sm:$0xff]  }
  0x26   :  { %v964_v29 = vld [vmem:[#allocation6 + $0x4] ss:$16 sps:$4 sm:$0xff]   ;;  %v966_v30 = vld [vmem:[#allocation6 + $0xc] ss:$16 sps:$4 sm:$0xff]   ;;  %v968_v31 = vld [vmem:[#allocation6] ss:$16 sps:$4 sm:$0xff]  }
  0x27   :  { %298 = vmatpush1.bf16.msra.mxu0 %v938_v11  ;;  %339 = vmatpush1.bf16.msra.mxu1 %v939_v12  ;;  %v969_v32 = vld [vmem:[#allocation6 + $0x8] ss:$16 sps:$4 sm:$0xff]   ;;  %v972_v34 = vld [vmem:[#allocation3 + $0xe4] ss:$16 sps:$4 sm:$0xff]   ;;  %v975_v35 = vld [vmem:[#allocation3 + $0xec] ss:$16 sps:$4 sm:$0xff]  }
  0x28   :  { %299 = vmatprep.subr.bf16.mxu0 %v940_v13  ;;  %340 = vmatprep.subr.bf16.mxu1 %v942_v14  ;;  %v970_v37 = vld [vmem:[#allocation3 + $0xe0] ss:$16 sps:$4 sm:$0xff]   ;;  %v973_v38 = vld [vmem:[#allocation3 + $0xe8] ss:$16 sps:$4 sm:$0xff]   ;;  %v978_v39 = vld [vmem:[#allocation3 + $0xc4] ss:$16 sps:$4 sm:$0xff]  }
  0x29   :  { %v981_v40 = vld [vmem:[#allocation3 + $0xcc] ss:$16 sps:$4 sm:$0xff]   ;;  %v976_v41 = vld [vmem:[#allocation3 + $0xc0] ss:$16 sps:$4 sm:$0xff]   ;;  %v979_v42 = vld [vmem:[#allocation3 + $0xc8] ss:$16 sps:$4 sm:$0xff]  }
  0x2a   :  { %v984_v43 = vld [vmem:[#allocation3 + $0xa4] ss:$16 sps:$4 sm:$0xff]   ;;  %v987_v44 = vld [vmem:[#allocation3 + $0xac] ss:$16 sps:$4 sm:$0xff]   ;;  %v982_v45 = vld [vmem:[#allocation3 + $0xa0] ss:$16 sps:$4 sm:$0xff]  }
  0x2b   :  { %300 = vmatpush1.bf16.msra.mxu0 %v944_v15  ;;  %341 = vmatpush1.bf16.msra.mxu1 %v945_v16  ;;  %v985_v46 = vld [vmem:[#allocation3 + $0xa8] ss:$16 sps:$4 sm:$0xff]   ;;  %v990_v47 = vld [vmem:[#allocation3 + $0x84] ss:$16 sps:$4 sm:$0xff]   ;;  %v993_v48 = vld [vmem:[#allocation3 + $0x8c] ss:$16 sps:$4 sm:$0xff]  }
  0x2c   :  { %301 = vmatprep.subr.bf16.mxu0 %v946_v17  ;;  %342 = vmatprep.subr.bf16.mxu1 %v948_v18  ;;  %v988_v49 = vld [vmem:[#allocation3 + $0x80] ss:$16 sps:$4 sm:$0xff]   ;;  %v991_v50 = vld [vmem:[#allocation3 + $0x88] ss:$16 sps:$4 sm:$0xff]   ;;  %v996_v51 = vld [vmem:[#allocation3 + $0x64] ss:$16 sps:$4 sm:$0xff]  }
  0x2d   :  { %v999_v52 = vld [vmem:[#allocation3 + $0x6c] ss:$16 sps:$4 sm:$0xff]   ;;  %v994_v53 = vld [vmem:[#allocation3 + $0x60] ss:$16 sps:$4 sm:$0xff]   ;;  %v997_v54 = vld [vmem:[#allocation3 + $0x68] ss:$16 sps:$4 sm:$0xff]  }
  0x2e   :  { %v1002_v55 = vld [vmem:[#allocation3 + $0x44] ss:$16 sps:$4 sm:$0xff]   ;;  %v1005_v56 = vld [vmem:[#allocation3 + $0x4c] ss:$16 sps:$4 sm:$0xff]   ;;  %v1000_v57 = vld [vmem:[#allocation3 + $0x40] ss:$16 sps:$4 sm:$0xff]  }
  0x2f   :  { %302 = vmatpush1.bf16.msra.mxu0 %v950_v19  ;;  %343 = vmatpush1.bf16.msra.mxu1 %v951_v20  ;;  %v1003_v58 = vld [vmem:[#allocation3 + $0x48] ss:$16 sps:$4 sm:$0xff]   ;;  %v1008_v59 = vld [vmem:[#allocation3 + $0x24] ss:$16 sps:$4 sm:$0xff]   ;;  %v1011_v60 = vld [vmem:[#allocation3 + $0x2c] ss:$16 sps:$4 sm:$0xff]  }
  0x30   :  { %303 = vmatprep.subr.bf16.mxu0 %v952_v21  ;;  %344 = vmatprep.subr.bf16.mxu1 %v954_v22  ;;  %v1006_v61 = vld [vmem:[#allocation3 + $0x20] ss:$16 sps:$4 sm:$0xff]   ;;  %v1009_v62 = vld [vmem:[#allocation3 + $0x28] ss:$16 sps:$4 sm:$0xff]   ;;  %v1014_v63 = vld [vmem:[#allocation3 + $0x4] ss:$16 sps:$4 sm:$0xff]   ;;  %v619_v21 = vlaneseq }
  0x31   :  { %v1012_v1 = vld [vmem:[#allocation3] ss:$16 sps:$4 sm:$0xff]   ;;  %v1015_v2 = vld [vmem:[#allocation3 + $0x8] ss:$16 sps:$4 sm:$0xff]   ;;  %v66_v3 = vld [vmem:[%s1229_s0] sm:$0xf] }
  0x32   :  { %v1018_v4 = vld [vmem:[%s1235_s6 + $0x38] sm:$0xff]   ;;  %v1113_v5 = vmov 0.0   ;;  %v1019_v6 = vld [vmem:[%s1235_s6 + $0x30] sm:$0xff]   ;;  %v1020_v7 = vld [vmem:[%s1235_s6 + $0x28] sm:$0xff]   ;;  %vm1114_vm0 = vmmov 0   ;;  %v620_v22 = vshrl.u32 %v619_v21, 7 }
  0x33   :  { %304 = vmatpush1.bf16.msra.mxu0 %v956_v23  ;;  %345 = vmatpush1.bf16.msra.mxu1 %v957_v24  ;;  %v1021_v8 = vld [vmem:[%s1235_s6 + $0x20] sm:$0xff]   ;;  %v1022_v9 = vld [vmem:[%s1235_s6 + $0x18] sm:$0xff]   ;;  %v1023_v10 = vld [vmem:[%s1235_s6 + $0x10] sm:$0xff]   ;;  %s1115_s25 = smov [#allocation8]  }
  0x34   :  { %305 = vmatprep.subr.bf16.mxu0 %v958_v25  ;;  %346 = vmatprep.subr.bf16.mxu1 %v960_v26  ;;  %v1024_v11 = vld [vmem:[%s1235_s6 + $0x8] sm:$0xff]   ;;  %v1025_v12 = vld [vmem:[%s1235_s6] sm:$0xff]   ;;  %v621_v23 = vsub.s32 0, %v620_v22  ;;  %v625_v25 = vsub.s32 1, %v620_v22  ;;  %s791_s26 = sshll.u32 %s1115_s25, 4  ;;  %s792_s26 = int_to_ptr.vmem [resolvable:$true] %s791_s26 }
  0x35   :  { %v617_v24 = vld [vmem:[%s1234_s5] sm:$0xf]  ;;  %p1087_p11 = scmp.lt.s32.totalorder %s792_s26, %s792_s26 }
  0x36   :  { %v622_v26 = vrot.slane %v617_v24, %v621_v23 }
  0x37   :  { %306 = vmatpush1.bf16.msra.mxu0 %v962_v27  ;;  %347 = vmatpush1.bf16.msra.mxu1 %v963_v28 }
  0x38   :  { %307 = vmatprep.subr.bf16.mxu0 %v964_v29  ;;  %348 = vmatprep.subr.bf16.mxu1 %v966_v30  ;;  %v626_v30 = vrot.slane %v617_v24, %v625_v25 }
  0x3b   :  { %308 = vmatpush1.bf16.msra.mxu0 %v968_v31  ;;  %349 = vmatpush1.bf16.msra.mxu1 %v969_v32 }
  0x3c   :  { %535 = vmatprep.subr.bf16.mxu0 %v972_v34  ;;  %576 = vmatprep.subr.bf16.mxu1 %v975_v35 }
  0x3e   :  { %326 = vmatmul.mubr.bf16.vlgmr.msra.gmra.mxu0 %v68_v36  ;;  %367 = vmatmul.mubr.bf16.vlgmr.msra.gmra.mxu1 %v68_v36 }
  0x3f   :  { %536 = vmatpush1.bf16.msra.mxu0 %v970_v37  ;;  %577 = vmatpush1.bf16.msra.mxu1 %v973_v38 }
  0x40   :  { %537 = vmatprep.subr.bf16.mxu0 %v978_v39  ;;  %578 = vmatprep.subr.bf16.mxu1 %v981_v40  ;;  %v633_v39 = vsub.s32 3, %v620_v22 }
  0x41   :  { %567 = vmatprep.mubr.bf16.mxu0 %v1112_v0  ;;  %608 = vmatprep.mubr.bf16.mxu1 %v1112_v0  ;;  %v1017_v0 = vld [vmem:[#allocation3 + $0xc] ss:$16 sps:$4 sm:$0xff]  }
  0x43   :  { %538 = vmatpush1.bf16.msra.mxu0 %v976_v41  ;;  %579 = vmatpush1.bf16.msra.mxu1 %v979_v42 }
  0x44   :  { %539 = vmatprep.subr.bf16.mxu0 %v984_v43  ;;  %580 = vmatprep.subr.bf16.mxu1 %v987_v44  ;;  %v634_v44 = vrot.slane %v617_v24, %v633_v39 }
  0x47   :  { %540 = vmatpush1.bf16.msra.mxu0 %v982_v45  ;;  %581 = vmatpush1.bf16.msra.mxu1 %v985_v46  ;;  %v629_v45 = vsub.s32 2, %v620_v22 }
  0x48   :  { %541 = vmatprep.subr.bf16.mxu0 %v990_v47  ;;  %582 = vmatprep.subr.bf16.mxu1 %v993_v48 }
  0x49   :  { %v630_v48 = vrot.slane %v617_v24, %v629_v45 }
  0x4b   :  { %542 = vmatpush1.bf16.msra.mxu0 %v988_v49  ;;  %583 = vmatpush1.bf16.msra.mxu1 %v991_v50 }
  0x4c   :  { %543 = vmatprep.subr.bf16.mxu0 %v996_v51  ;;  %584 = vmatprep.subr.bf16.mxu1 %v999_v52 }
  0x4f   :  { %544 = vmatpush1.bf16.msra.mxu0 %v994_v53  ;;  %585 = vmatpush1.bf16.msra.mxu1 %v997_v54 }
  0x50   :  { %545 = vmatprep.subr.bf16.mxu0 %v1002_v55  ;;  %586 = vmatprep.subr.bf16.mxu1 %v1005_v56 }
  0x53   :  { %546 = vmatpush1.bf16.msra.mxu0 %v1000_v57  ;;  %587 = vmatpush1.bf16.msra.mxu1 %v1003_v58  ;;  %v662_v57 = vld [vmem:[%s1231_s2] sm:$0xff] }
  0x54   :  { %547 = vmatprep.subr.bf16.mxu0 %v1008_v59  ;;  %588 = vmatprep.subr.bf16.mxu1 %v1011_v60 }
  0x57   :  { %548 = vmatpush1.bf16.msra.mxu0 %v1006_v61  ;;  %589 = vmatpush1.bf16.msra.mxu1 %v1009_v62 }
  0x58   :  { %549 = vmatprep.subr.bf16.mxu0 %v1014_v63  ;;  %590 = vmatprep.subr.bf16.mxu1 %v1017_v0 }
  0x5b   :  { %550 = vmatpush1.bf16.msra.mxu0 %v1012_v1  ;;  %591 = vmatpush1.bf16.msra.mxu1 %v1015_v2 }
  0x5c   :  { %894 = vmatprep.subr.bf16.mxu0 %v1113_v5 }
  0x5e   :  { %568 = vmatmul.mubr.bf16.vlgmr.msra.gmra.mxu0 %v66_v3  ;;  %609 = vmatmul.mubr.bf16.vlgmr.msra.gmra.mxu1 %v66_v3 }
  0x5f   :  { %895 = vmatpush3.bf16.msra.mxu0 %v1018_v4  ;;  %910 = vmatprep.mubr.msk.bf16.mxu0 %vm1114_vm0, %v1113_v5 }
  0x60   :  { %896 = vmatprep.subr.bf16.mxu0 %v1113_v5 }
  0x63   :  { %897 = vmatpush3.bf16.msra.mxu0 %v1019_v6 }
  0x64   :  { %898 = vmatprep.subr.bf16.mxu0 %v1113_v5 }
  0x67   :  { %899 = vmatpush3.bf16.msra.mxu0 %v1020_v7 }
  0x68   :  { %900 = vmatprep.subr.bf16.mxu0 %v1113_v5 }
  0x6b   :  { %901 = vmatpush3.bf16.msra.mxu0 %v1021_v8 }
  0x6c   :  { %902 = vmatprep.subr.bf16.mxu0 %v1113_v5 }
  0x6f   :  { %903 = vmatpush3.bf16.msra.mxu0 %v1022_v9 }
  0x70   :  { %904 = vmatprep.subr.bf16.mxu0 %v1113_v5 }
  0x73   :  { %905 = vmatpush3.bf16.msra.mxu0 %v1023_v10 }
  0x74   :  { %906 = vmatprep.subr.bf16.mxu0 %v1113_v5 }
  0x77   :  { %907 = vmatpush3.bf16.msra.mxu0 %v1024_v11 }
  0x78   :  { %908 = vmatprep.subr.bf16.mxu0 %v1113_v5  ;;  %v876_v5 = vld [vmem:[%s1236_s7] ss:$0 sm:$0xff] }
  0x7b   :  { %909 = vmatpush3.bf16.msra.mxu0 %v1025_v12 }
  0xfe   :  { %v327_v13 = vpop.f32.mrf.mxu0  ;;  %v368_v14 = vpop.f32.mrf.mxu1 }
 0x100   :  { %v329_v15 = vpop.f32.mrf.mxu0  ;;  %v370_v16 = vpop.f32.mrf.mxu1 }
 0x102   :  { %v331_v17 = vpop.f32.mrf.mxu0  ;;  %v372_v18 = vpop.f32.mrf.mxu1 }
 0x104   :  { %v332_v19 = vpop.f32.mrf.mxu0  ;;  %v373_v20 = vpop.f32.mrf.mxu1 }
 0x11e   :  { %v569_v27 = vpop.f32.mrf.mxu0  ;;  %v610_v28 = vpop.f32.mrf.mxu1 }
 0x11f   :  { %v570_v29 = vadd.f32 %v569_v27, %v327_v13  ;;  %v611_v47 = vadd.f32 %v610_v28, %v368_v14 }
 0x120   :  { %v571_v31 = vpop.f32.mrf.mxu0  ;;  %v612_v32 = vpop.f32.mrf.mxu1 }
 0x121   :  { %v639_v33 = vadd.f32 %v622_v26, %v570_v29  ;;  %v572_v34 = vadd.f32 %v571_v31, %v329_v15  ;;  %v613_v43 = vadd.f32 %v612_v32, %v370_v16  ;;  %v641_v51 = vadd.f32 %v630_v48, %v611_v47 }
 0x122   :  { %v573_v35 = vpop.f32.mrf.mxu0  ;;  %v614_v36 = vpop.f32.mrf.mxu1 }
 0x123   :  { %v873_v37 = vmul.f32 -1.442695, %v639_v33  ;;  %v640_v38 = vadd.f32 %v626_v30, %v572_v34  ;;  %v642_v46 = vadd.f32 %v634_v44, %v613_v43 }
 0x124   :  { %v574_v40 = vpop.f32.mrf.mxu0  ;;  %v615_v41 = vpop.f32.mrf.mxu1 }
 0x125   :  { %1026 = vpow2.f32 %v873_v37  ;;  %v874_v42 = vmul.f32 -1.442695, %v640_v38  ;;  %v875_v49 = vmul.f32 -1.442695, %v642_v46 }
 0x127   :  { %1028 = vpow2.f32 %v874_v42 }
 0x128   :  { %1030 = vpow2.f32 %v875_v49 }
 0x132   :  { %v1027_v50 = vpop.eup %1026 }
 0x133   :  { %v646_v52 = vadd.f32 1.0, %v1027_v50 }
 0x134   :  { %v1029_v53 = vpop.eup %1028 }
 0x135   :  { %1032 = vrcp.f32 %v646_v52  ;;  %v652_v54 = vadd.f32 1.0, %v1029_v53  ;;  %v1031_v55 = vpop.eup %1030 }
 0x136   :  { %1034 = vtanh.f32 %v641_v51  ;;  %v659_v60 = vadd.f32 1.0, %v1031_v55 }
 0x137   :  { %1036 = vrcp.f32 %v652_v54 }
 0x138   :  { %1038 = vrcp.f32 %v659_v60 }
 0x142   :  { %v1033_v56 = vpop.eup %1032 }
 0x143   :  { %v1035_v58 = vpop.eup %1034 }
 0x144   :  { %v1037_v59 = vpop.eup %1036  ;;  %v664_v61 = vmul.f32 %v1035_v58, %v1033_v56 }
 0x145   :  { %v663_v62 = vmul.f32 %v1037_v59, %v662_v57  ;;  %v1039_v0 = vpop.eup %1038 }
 0x147   :  { %v665_v63 = vadd.f32 %v664_v61, %v663_v62 }
 0x149   :  { %1040 = vtanh.f32 %v665_v63  ;;  %668 = vst [vmem:[%s1239_s10] sm:$0xff] %v665_v63  ;;  %s1082_s10 = scalar_lea.vmem %s792_s26, 128 }
 0x14a   :  { %p1083_p10 = scmp.ne.s32.totalorder %s792_s26, %s1082_s10  ;;  %p1088_p12 = scmp.lt.s32.totalorder %s1082_s10, %s1082_s10 }
 0x14c   :  { %p1089_p13 = por %p1088_p12, %p1087_p11 }
 0x14e   :  { %p1090_p0 = pnand %p1089_p13, %p1083_p10 }
 0x156   :  { %v1041_v1 = vpop.eup %1040 }
 0x157   :  { %v667_v2 = vmul.f32 %v1041_v1, %v1039_v0 }
 0x159   :  { %669 = vst [vmem:[%s1238_s9] sm:$0xff] %v667_v2  ;;  %v670_v3 = vpack.c.bf16 %v667_v2, %v667_v2 }
 0x15b   :  { %671 = vst [vmem:[#allocation2] sm:$0xf] %v670_v3 }
 0x162   :  { %v672_v4 = vld [vmem:[#allocation2] sm:$0xf] }
 0x163   :  { %911 = vmatmul.mubr.bf16.vlgmr.msra.gmra.mxu0 %v672_v4 }
 0x223   :  { %v778_v6 = vpop.f32.mrf.mxu0 }
 0x224   :  { %v779_v7 = vadd.f32 %v876_v5, %v778_v6 }
 0x225   :  { %v912_v8 = vpop.f32.mrf.mxu0 }
 0x226   :  { %784 = vst [vmem:[#allocation8] sm:$0xff] %v779_v7 }
 0x227   :  { %v781_v9 = vpop.f32.mrf.mxu0 }
 0x228   :  { %1093 = shalt.err (!%p1090_p0)
}
 0x229   :  { %794 = dma.vmem_to_hbm [thread:$0]  %s792_s26, 128, %s1237_s8, [#allocation5]   ;;  %v913_v10 = vpop.f32.mrf.mxu0 }
 0x22a   :  { %1106 = dma.done.wait [#allocation5], 128  }
 0x22b   :  { %1107 = vsyncadd [#allocation5], 4294967168 }
 0x22c   :  { %806 = vsyncpa [#allocation4], 1 }
 0x22d   :  { %807 = vsyncpa [#allocation7], 1 }
 0x22e   :  { %808 = vsyncpa [#allocation5], 1 }

</bundles_post_ra>
